<compile_context>
chip_gen: v5e
topology: v5e:2x2
jax: 0.10.0
libtpu: 0.0.40
codegen_flags: <defaults>
</compile_context>

<pallas_src>
import functools

import numpy as np
import jax
import jax.numpy as jnp
from jax import lax
from jax.experimental import pallas as pl
from jax.experimental.pallas import tpu as pltpu


def _round_up(x, m):
    return (x + m - 1) // m * m


# --------------------------------------------------------------------------
# Kernel 1: plain block-complex matmul (eval-BN with host-folded scale, no-BN).
# --------------------------------------------------------------------------
def _wmm_kernel(w_ref, f_ref, out_ref):
    out_ref[...] = jnp.dot(w_ref[...], f_ref[...],
                           preferred_element_type=jnp.float32)


# --------------------------------------------------------------------------
# Kernel 2: training-mode fused BN statistics + matmul (2-phase grid).
#   grid = (2, n_tiles): phase 0 = stats over all BM tiles, phase 1 = matmul.
# --------------------------------------------------------------------------
def _bn_wmm_kernel(w_ref, std_ref, invc_ref, f_ref, out_ref, newstd_ref,
                   ss_acc, w_scaled, *, tf_pad, eps, bn_cnt):
    p = pl.program_id(0)          # phase
    j = pl.program_id(1)          # BM tile
    nj = pl.num_programs(1)

    @pl.when(jnp.logical_and(p == 0, j == 0))
    def _init():
        ss_acc[...] = jnp.zeros_like(ss_acc)

    @pl.when(p == 0)
    def _stats():
        f = f_ref[...]
        fr = f[:tf_pad, :]
        fi = f[tf_pad:, :]
        sq = fr * fr + fi * fi                               # (tf_pad, tile)
        ones = jnp.ones((1, sq.shape[1]), jnp.float32)
        # Per-fragment sum of squares produced directly in lane orientation
        # (1, tf_pad) via a transposed-RHS matmul; accumulated across tiles.
        ss = lax.dot_general(ones, sq, (((1,), (1,)), ((), ())),
                             preferred_element_type=jnp.float32)
        ss_acc[...] += ss

    @pl.when(jnp.logical_and(p == 0, j == nj - 1))
    def _fold():
        invc = invc_ref[...]
        batch_std = jnp.sqrt(ss_acc[...] * invc)
        std = (std_ref[...] * bn_cnt + batch_std) / (bn_cnt + 1.0)
        newstd_ref[...] = std
        # Explicitly mask padding fragments (invc == 0) so scale is 0 there.
        mask = (invc > 0.0).astype(jnp.float32)
        scale = mask / (std + eps)                           # (1, tf_pad)
        scale_blk = jnp.concatenate([scale, scale], axis=1)  # (1, 2*tf_pad)
        w_scaled[...] = w_ref[...] * scale_blk

    @pl.when(p == 1)
    def _matmul():
        out_ref[...] = jnp.dot(w_scaled[...], f_ref[...],
                               preferred_element_type=jnp.float32)


# --------------------------------------------------------------------------
# Module-level wrapper (mirrors MyBatchNormWeightMM_cuda.forward)
# --------------------------------------------------------------------------
def my_batchnorm_weight_mm(FF, W, bn_stds, t_FF, t_O, *, lmax, eps=1e-5,
                           bn_cnt=1.0, batchnorm=True, training=True,
                           max_bm_tile=1024):
    t_FF = np.asarray(t_FF, dtype=np.int64)
    t_O = np.asarray(t_O, dtype=np.int64)
    mults = 1 + 2 * np.arange(lmax + 1)
    cumu_tm_FF = np.concatenate([[0], (t_FF * mults).cumsum()]).astype(int)
    cumu_tt_W = np.concatenate([[0], (t_FF * t_O).cumsum()]).astype(int)
    cumu_t_FF = np.concatenate([[0], t_FF.cumsum()]).astype(int)
    cumu_t_O = np.concatenate([[0], t_O.cumsum()]).astype(int)
    TF = int(t_FF.sum())
    TO = int(t_O.sum())
    B = int(FF.shape[0])
    M_max = 2 * lmax + 1
    BM = B * M_max
    TF_pad = _round_up(TF, 8)
    TO_pad = _round_up(TO, 8)
    BM_pad = _round_up(max(BM, 128), 128)

    FF = FF.astype(jnp.float32)
    W = W.astype(jnp.float32)

    # ---- choose the BM tile: multiple of 128, divides BM_pad, fits VMEM ----
    vmem_budget = 32 * 1024 * 1024      # v7x-safe working-set budget

    def tile_bytes(t):
        f_b = 2 * (2 * TF_pad) * t * 4          # double-buffered f tile
        o_b = 2 * (2 * TO_pad) * t * 4          # double-buffered out tile
        w_b = 3 * (2 * TO_pad) * (2 * TF_pad) * 4   # weight input + scratch
        return f_b + o_b + w_b + 64 * 1024

    n128 = BM_pad // 128
    bm_tile = 128
    for k in range(1, n128 + 1):
        t = 128 * k
        if t > max_bm_tile:
            break
        if n128 % k == 0 and tile_bytes(t) <= vmem_budget:
            bm_tile = t
    n_tiles = BM_pad // bm_tile
    vmem_limit = 48 * 1024 * 1024

    # ---- pack FF into one (2*TF_pad, BM_pad) real/imag slab ----------------
    rows_re, rows_im = [], []
    for l in range(lmax + 1):
        tf, m = int(t_FF[l]), 2 * l + 1
        seg = FF[:, cumu_tm_FF[l]:cumu_tm_FF[l + 1], :].reshape(B, tf, m, 2)
        seg = jnp.transpose(seg, (1, 0, 2, 3))                 # (tf, B, m, 2)
        seg = jnp.pad(seg, ((0, 0), (0, 0), (0, M_max - m), (0, 0)))
        rows_re.append(seg[..., 0].reshape(tf, BM))
        rows_im.append(seg[..., 1].reshape(tf, BM))
    f_re = jnp.concatenate(rows_re, axis=0)                    # (TF, BM)
    f_im = jnp.concatenate(rows_im, axis=0)
    pad2 = ((0, TF_pad - TF), (0, BM_pad - BM))
    f_slab = jnp.concatenate([jnp.pad(f_re, pad2), jnp.pad(f_im, pad2)], axis=0)

    # ---- block-diagonal complex weights, assembled on host ------------------
    wr_rows, wi_rows = [], []
    for l in range(lmax + 1):
        tf, to = int(t_FF[l]), int(t_O[l])
        wl = W[cumu_tt_W[l]:cumu_tt_W[l + 1], :].reshape(to, tf, 2)
        cpad = ((0, 0), (int(cumu_t_FF[l]), TF_pad - int(cumu_t_FF[l + 1])))
        wr_rows.append(jnp.pad(wl[..., 0], cpad))
        wi_rows.append(jnp.pad(wl[..., 1], cpad))
    rpad = ((0, TO_pad - TO), (0, 0))
    wr = jnp.pad(jnp.concatenate(wr_rows, axis=0), rpad)       # (TO_pad, TF_pad)
    wi = jnp.pad(jnp.concatenate(wi_rows, axis=0), rpad)
    w_blk = jnp.concatenate(
        [jnp.concatenate([wr, -wi], axis=1),
         jnp.concatenate([wi, wr], axis=1)], axis=0)           # (2*TO_pad, 2*TF_pad)

    training_bn = bool(batchnorm) and bool(training)

    if training_bn:
        # ---- 2-phase fused BN-stats + matmul kernel --------------------------
        std_in = jnp.pad(bn_stds.astype(jnp.float32),
                         (0, TF_pad - TF)).reshape(1, TF_pad)
        counts = np.repeat((B * mults).astype(np.float32), t_FF)   # (TF,)
        inv_c_np = np.zeros((1, TF_pad), np.float32)
        inv_c_np[0, :TF] = 1.0 / counts
        inv_c = jnp.asarray(inv_c_np)

        kernel = functools.partial(_bn_wmm_kernel, tf_pad=TF_pad,
                                   eps=float(eps), bn_cnt=float(bn_cnt))
        flops = 2 * (2 * TO_pad) * (2 * TF_pad) * BM_pad + 5 * TF_pad * BM_pad
        bytes_accessed = 4 * (2 * (2 * TF_pad) * BM_pad
                              + (2 * TO_pad) * BM_pad
                              + (2 * TO_pad) * (2 * TF_pad) + 3 * TF_pad)
        out_slab, new_std = pl.pallas_call(
            kernel,
            out_shape=(jax.ShapeDtypeStruct((2 * TO_pad, BM_pad), jnp.float32),
                       jax.ShapeDtypeStruct((1, TF_pad), jnp.float32)),
            grid=(2, n_tiles),
            in_specs=[
                pl.BlockSpec((2 * TO_pad, 2 * TF_pad), lambda p, j: (0, 0)),
                pl.BlockSpec((1, TF_pad), lambda p, j: (0, 0)),
                pl.BlockSpec((1, TF_pad), lambda p, j: (0, 0)),
                pl.BlockSpec((2 * TF_pad, bm_tile), lambda p, j: (0, j)),
            ],
            out_specs=(
                # (0, j*p): stays on block 0 during the stats phase, so no
                # garbage writebacks; phase 1 streams the real output tiles.
                pl.BlockSpec((2 * TO_pad, bm_tile), lambda p, j: (0, j * p)),
                pl.BlockSpec((1, TF_pad), lambda p, j: (0, 0)),
            ),
            scratch_shapes=[pltpu.VMEM((1, TF_pad), jnp.float32),
                            pltpu.VMEM((2 * TO_pad, 2 * TF_pad), jnp.float32)],
            compiler_params=pltpu.CompilerParams(
                dimension_semantics=("arbitrary", "arbitrary"),
                vmem_limit_bytes=vmem_limit),
            cost_estimate=pl.CostEstimate(flops=int(flops),
                                          transcendentals=int(TF_pad),
                                          bytes_accessed=int(bytes_accessed)),
        )(w_blk, std_in, inv_c, f_slab)
        new_bn_stds = new_std[0, :TF]
    else:
        # ---- eval-BN / no-BN: fold the scale into W on host ------------------
        if batchnorm:
            std = bn_stds.astype(jnp.float32)
            scale = 1.0 / (std + eps)
            scale = jnp.pad(scale, (0, TF_pad - TF))        # 0 on padding frags
            scale_row = jnp.concatenate([scale, scale]).reshape(1, 2 * TF_pad)
            w_use = w_blk * scale_row
            new_bn_stds = bn_stds
        else:
            w_use = w_blk
            new_bn_stds = None
        flops = 2 * (2 * TO_pad) * (2 * TF_pad) * BM_pad
        bytes_accessed = 4 * ((2 * TF_pad) * BM_pad + (2 * TO_pad) * BM_pad
                              + (2 * TO_pad) * (2 * TF_pad))
        out_slab = pl.pallas_call(
            _wmm_kernel,
            out_shape=jax.ShapeDtypeStruct((2 * TO_pad, BM_pad), jnp.float32),
            grid=(n_tiles,),
            in_specs=[
                pl.BlockSpec((2 * TO_pad, 2 * TF_pad), lambda j: (0, 0)),
                pl.BlockSpec((2 * TF_pad, bm_tile), lambda j: (0, j)),
            ],
            out_specs=pl.BlockSpec((2 * TO_pad, bm_tile), lambda j: (0, j)),
            compiler_params=pltpu.CompilerParams(
                dimension_semantics=("parallel",),
                vmem_limit_bytes=vmem_limit),
            cost_estimate=pl.CostEstimate(flops=int(flops),
                                          transcendentals=0,
                                          bytes_accessed=int(bytes_accessed)),
        )(w_use, f_slab)

    # ---- unpack the lane-dense slab back to (B, sum_l t_O*(2l+1), 2) --------
    outs = []
    for l in range(lmax + 1):
        to, m = int(t_O[l]), 2 * l + 1
        r0 = int(cumu_t_O[l])
        o_re = out_slab[r0:r0 + to, :BM].reshape(to, B, M_max)[:, :, :m]
        o_im = out_slab[TO_pad + r0:TO_pad + r0 + to, :BM].reshape(
            to, B, M_max)[:, :, :m]
        o = jnp.stack([o_re, o_im], axis=-1)                   # (to, B, m, 2)
        outs.append(jnp.transpose(o, (1, 0, 2, 3)).reshape(B, to * m, 2))
    output = jnp.concatenate(outs, axis=1)                     # (B, cumu_tm_O[-1], 2)
    return output, new_bn_stds


# --------------------------------------------------------------------------
# Pure-JAX reference (same math, no Pallas) for a sanity check
# --------------------------------------------------------------------------
def _reference(FF, W, bn_stds, t_FF, t_O, *, lmax, eps, bn_cnt,
               batchnorm, training):
    t_FF = np.asarray(t_FF); t_O = np.asarray(t_O)
    mults = 1 + 2 * np.arange(lmax + 1)
    cumu_tm_FF = np.concatenate([[0], (t_FF * mults).cumsum()]).astype(int)
    cumu_tt_W = np.concatenate([[0], (t_FF * t_O).cumsum()]).astype(int)
    cumu_t_FF = np.concatenate([[0], t_FF.cumsum()]).astype(int)
    B = FF.shape[0]
    outs, stds = [], []
    for l in range(lmax + 1):
        m = 2 * l + 1
        ff = FF[:, cumu_tm_FF[l]:cumu_tm_FF[l + 1], :].reshape(B, int(t_FF[l]), m, 2)
        fc = ff[..., 0] + 1j * ff[..., 1]                       # (B, tf, m)
        w = W[cumu_tt_W[l]:cumu_tt_W[l + 1], :].reshape(int(t_O[l]), int(t_FF[l]), 2)
        wc = w[..., 0] + 1j * w[..., 1]                         # (to, tf)
        if batchnorm:
            std = bn_stds[cumu_t_FF[l]:cumu_t_FF[l + 1]]
            if training:
                new = jnp.sqrt(jnp.mean(jnp.abs(fc) ** 2, axis=(0, 2)))
                std = (std * bn_cnt + new) / (bn_cnt + 1.0)
            stds.append(std)
            fc = fc / (std + eps)[None, :, None]
        oc = jnp.einsum('of,bfm->bom', wc, fc)                  # (B, to, m)
        outs.append(jnp.stack([oc.real, oc.imag], axis=-1).reshape(B, int(t_O[l]) * m, 2))
    out = jnp.concatenate(outs, axis=1)
    new_stds = jnp.concatenate(stds) if batchnorm else None
    return out, new_stds


if __name__ == "__main__":
    # Small config consistent with the module: lmax=2, per-l input/output taus.
    lmax = 2
    t_FF = [4, 3, 2]
    t_O = [3, 2, 2]
    weight_scale = 0.05
    eps = 1e-5
    bn_cnt = 1.0

    mults = 1 + 2 * np.arange(lmax + 1)
    total_FF = int(np.sum(np.asarray(t_FF) * mults))        # 23
    total_O = int(np.sum(np.asarray(t_O) * mults))           # 19
    wlen = int(np.sum(np.asarray(t_FF) * np.asarray(t_O)))   # 22
    bnlen = int(np.sum(t_FF))                                # 9

    key = jax.random.PRNGKey(0)
    k1, k2, k3 = jax.random.split(key, 3)
    W = weight_scale * jax.random.uniform(k2, (wlen, 2), dtype=jnp.float32)
    bn_stds = jax.random.uniform(k3, (bnlen,), dtype=jnp.float32)

    def check(B, max_bm_tile):
        FF = jax.random.normal(jax.random.fold_in(k1, B),
                               (B, total_FF, 2), dtype=jnp.float32)

        # --- training mode (BN stats update, 2-phase kernel) ---
        out, new_stds = my_batchnorm_weight_mm(
            FF, W, bn_stds, t_FF, t_O, lmax=lmax, eps=eps, bn_cnt=bn_cnt,
            batchnorm=True, training=True, max_bm_tile=max_bm_tile)
        jax.block_until_ready(out)
        jax.block_until_ready(new_stds)
        assert out.shape == (B, total_O, 2), out.shape
        assert new_stds.shape == (bnlen,), new_stds.shape
        ref_out, ref_stds = _reference(FF, W, bn_stds, t_FF, t_O, lmax=lmax,
                                       eps=eps, bn_cnt=bn_cnt, batchnorm=True,
                                       training=True)
        np.testing.assert_allclose(np.asarray(out), np.asarray(ref_out),
                                   rtol=1e-5, atol=1e-5)
        np.testing.assert_allclose(np.asarray(new_stds), np.asarray(ref_stds),
                                   rtol=1e-5, atol=1e-5)

        # --- eval mode (running stats folded into W on host) ---
        out_e, _ = my_batchnorm_weight_mm(
            FF, W, bn_stds, t_FF, t_O, lmax=lmax, eps=eps, bn_cnt=bn_cnt,
            batchnorm=True, training=False, max_bm_tile=max_bm_tile)
        jax.block_until_ready(out_e)
        ref_e, _ = _reference(FF, W, bn_stds, t_FF, t_O, lmax=lmax, eps=eps,
                              bn_cnt=bn_cnt, batchnorm=True, training=False)
        np.testing.assert_allclose(np.asarray(out_e), np.asarray(ref_e),
                                   rtol=1e-5, atol=1e-5)

        # --- no batchnorm ---
        out_n, stds_n = my_batchnorm_weight_mm(
            FF, W, bn_stds, t_FF, t_O, lmax=lmax, eps=eps, bn_cnt=bn_cnt,
            batchnorm=False, training=True, max_bm_tile=max_bm_tile)
        jax.block_until_ready(out_n)
        assert stds_n is None
        ref_n, _ = _reference(FF, W, bn_stds, t_FF, t_O, lmax=lmax, eps=eps,
                              bn_cnt=bn_cnt, batchnorm=False, training=True)
        np.testing.assert_allclose(np.asarray(out_n), np.asarray(ref_n),
                                   rtol=1e-5, atol=1e-5)

    # Single-tile grid (B=2 -> one 128-wide BM tile).
    check(B=2, max_bm_tile=1024)
    # Multi-tile grid (B=52 -> 3 BM tiles of 128): exercises the 2-phase BN
    # accumulation across tiles and the pipelined/parallel matmul path.
    check(B=52, max_bm_tile=128)

    print("KERNEL_OK")
</pallas_src>

<mosaic_0001>
module attributes {stable_mosaic.version = 11 : i64} {
  func.func @_bn_wmm_kernel(%arg0: i32, %arg1: i32, %arg2: memref<16x32xf32, #tpu.memory_space<vmem>>, %arg3: memref<1x16xf32, #tpu.memory_space<vmem>>, %arg4: memref<1x16xf32, #tpu.memory_space<vmem>>, %arg5: memref<32x128xf32, #tpu.memory_space<vmem>>, %arg6: memref<16x128xf32, #tpu.memory_space<vmem>>, %arg7: memref<1x16xf32, #tpu.memory_space<vmem>>, %arg8: memref<1x16xf32, #tpu.memory_space<vmem>>, %arg9: memref<16x32xf32, #tpu.memory_space<vmem>>) attributes {dimension_semantics = [#tpu.dimension_semantics<arbitrary>, #tpu.dimension_semantics<arbitrary>], iteration_bounds = array<i64: 2, 1>, scalar_prefetch = 0 : i64, scratch_operands = 2 : i64, tpu.core_type = #tpu.core_type<tc>, window_params = [{pipeline_mode = #tpu.pipeline_mode<synchronous>, transform_indices = @transform_0, window_bounds = array<i64: 16, 32>}, {pipeline_mode = #tpu.pipeline_mode<synchronous>, transform_indices = @transform_1, window_bounds = array<i64: 1, 16>}, {pipeline_mode = #tpu.pipeline_mode<synchronous>, transform_indices = @transform_2, window_bounds = array<i64: 1, 16>}, {transform_indices = @transform_3, window_bounds = array<i64: 32, 128>}, {transform_indices = @transform_4, window_bounds = array<i64: 16, 128>}, {pipeline_mode = #tpu.pipeline_mode<synchronous>, transform_indices = @transform_5, window_bounds = array<i64: 1, 16>}]} {
    %c0_i32 = arith.constant 0 : i32
    %0 = arith.cmpi eq, %arg0, %c0_i32 : i32
    %c0_i32_0 = arith.constant 0 : i32
    %1 = arith.cmpi eq, %arg1, %c0_i32_0 : i32
    %2 = arith.andi %0, %1 : i1
    %3 = arith.extui %2 : i1 to i32
    %c0_i32_1 = arith.constant 0 : i32
    %4 = arith.cmpi ne, %3, %c0_i32_1 : i32
    scf.if %4 {
      %cst = arith.constant 0.000000e+00 : f32
      %16 = vector.broadcast %cst : f32 to vector<1x16xf32>
      %c0 = arith.constant 0 : index
      %c0_8 = arith.constant 0 : index
      %17 = vector.load %arg8[%c0, %c0_8] : memref<1x16xf32, #tpu.memory_space<vmem>>, vector<1x16xf32>
      tpu.vector_store %arg8[%c0, %c0_8], %16 {strides = array<i32>} : memref<1x16xf32, #tpu.memory_space<vmem>>, vector<1x16xf32>,
    } else {
    }
    %c0_i32_2 = arith.constant 0 : i32
    %5 = arith.cmpi eq, %arg0, %c0_i32_2 : i32
    %6 = arith.extui %5 : i1 to i32
    %c0_i32_3 = arith.constant 0 : i32
    %7 = arith.cmpi ne, %6, %c0_i32_3 : i32
    scf.if %7 {
      %c0 = arith.constant 0 : index
      %c0_8 = arith.constant 0 : index
      %16 = vector.load %arg5[%c0, %c0_8] : memref<32x128xf32, #tpu.memory_space<vmem>>, vector<32x128xf32>
      %17 = vector.extract_strided_slice %16 {offsets = [0, 0], sizes = [16, 128], strides = [1, 1]} : vector<32x128xf32> to vector<16x128xf32>
      %18 = vector.extract_strided_slice %16 {offsets = [16, 0], sizes = [16, 128], strides = [1, 1]} : vector<32x128xf32> to vector<16x128xf32>
      %19 = arith.mulf %17, %17 : vector<16x128xf32>
      %20 = arith.mulf %18, %18 : vector<16x128xf32>
      %21 = arith.addf %19, %20 : vector<16x128xf32>
      %cst = arith.constant 1.000000e+00 : f32
      %22 = vector.broadcast %cst : f32 to vector<1x128xf32>
      %cst_9 = arith.constant dense<0.000000e+00> : vector<1x16xf32>
      %23 = tpu.matmul %22, %21, %cst_9 {dimension_numbers = #tpu.dot_dimension_numbers<[1], [1], [0], [0], [0, 0, 1, 0], [], []>} : vector<1x128xf32>, vector<16x128xf32>, vector<1x16xf32> -> vector<1x16xf32>
      %c0_10 = arith.constant 0 : index
      %c0_11 = arith.constant 0 : index
      %24 = vector.load %arg8[%c0_10, %c0_11] : memref<1x16xf32, #tpu.memory_space<vmem>>, vector<1x16xf32>
      %25 = arith.addf %24, %23 : vector<1x16xf32>
      %c0_12 = arith.constant 0 : index
      %c0_13 = arith.constant 0 : index
      %26 = vector.load %arg8[%c0_12, %c0_13] : memref<1x16xf32, #tpu.memory_space<vmem>>, vector<1x16xf32>
      tpu.vector_store %arg8[%c0_12, %c0_13], %25 {strides = array<i32>} : memref<1x16xf32, #tpu.memory_space<vmem>>, vector<1x16xf32>,
    } else {
    }
    %c0_i32_4 = arith.constant 0 : i32
    %8 = arith.cmpi eq, %arg0, %c0_i32_4 : i32
    %c0_i32_5 = arith.constant 0 : i32
    %9 = arith.cmpi eq, %arg1, %c0_i32_5 : i32
    %10 = arith.andi %8, %9 : i1
    %11 = arith.extui %10 : i1 to i32
    %c0_i32_6 = arith.constant 0 : i32
    %12 = arith.cmpi ne, %11, %c0_i32_6 : i32
    scf.if %12 {
      %c0 = arith.constant 0 : index
      %c0_8 = arith.constant 0 : index
      %16 = vector.load %arg4[%c0, %c0_8] : memref<1x16xf32, #tpu.memory_space<vmem>>, vector<1x16xf32>
      %c0_9 = arith.constant 0 : index
      %c0_10 = arith.constant 0 : index
      %17 = vector.load %arg8[%c0_9, %c0_10] : memref<1x16xf32, #tpu.memory_space<vmem>>, vector<1x16xf32>
      %18 = arith.mulf %17, %16 : vector<1x16xf32>
      %19 = math.sqrt %18 : vector<1x16xf32>
      %c0_11 = arith.constant 0 : index
      %c0_12 = arith.constant 0 : index
      %20 = vector.load %arg3[%c0_11, %c0_12] : memref<1x16xf32, #tpu.memory_space<vmem>>, vector<1x16xf32>
      %cst = arith.constant 1.000000e+00 : f32
      %21 = vector.broadcast %cst : f32 to vector<1x16xf32>
      %22 = arith.mulf %20, %21 : vector<1x16xf32>
      %23 = arith.addf %22, %19 : vector<1x16xf32>
      %cst_13 = arith.constant 2.000000e+00 : f32
      %24 = vector.broadcast %cst_13 : f32 to vector<1x16xf32>
      %25 = arith.divf %23, %24 : vector<1x16xf32>
      %c0_14 = arith.constant 0 : index
      %c0_15 = arith.constant 0 : index
      %26 = vector.load %arg7[%c0_14, %c0_15] : memref<1x16xf32, #tpu.memory_space<vmem>>, vector<1x16xf32>
      tpu.vector_store %arg7[%c0_14, %c0_15], %25 {strides = array<i32>} : memref<1x16xf32, #tpu.memory_space<vmem>>, vector<1x16xf32>,
      %cst_16 = arith.constant 0.000000e+00 : f32
      %27 = vector.broadcast %cst_16 : f32 to vector<1x16xf32>
      %28 = arith.cmpf ogt, %16, %27 : vector<1x16xf32>
      %29 = arith.extui %28 : vector<1x16xi1> to vector<1x16xi32>
      %30 = arith.sitofp %29 : vector<1x16xi32> to vector<1x16xf32>
      %cst_17 = arith.constant 9.99999974E-6 : f32
      %31 = vector.broadcast %cst_17 : f32 to vector<1x16xf32>
      %32 = arith.addf %25, %31 : vector<1x16xf32>
      %33 = arith.divf %30, %32 : vector<1x16xf32>
      %34 = tpu.concatenate %33, %33 in 1 : vector<1x16xf32>, vector<1x16xf32> -> vector<1x32xf32>
      %c0_18 = arith.constant 0 : index
      %c0_19 = arith.constant 0 : index
      %35 = vector.load %arg2[%c0_18, %c0_19] : memref<16x32xf32, #tpu.memory_space<vmem>>, vector<16x32xf32>
      %36 = vector.broadcast %34 : vector<1x32xf32> to vector<16x32xf32>
      %37 = arith.mulf %35, %36 : vector<16x32xf32>
      %c0_20 = arith.constant 0 : index
      %c0_21 = arith.constant 0 : index
      %38 = vector.load %arg9[%c0_20, %c0_21] : memref<16x32xf32, #tpu.memory_space<vmem>>, vector<16x32xf32>
      tpu.vector_store %arg9[%c0_20, %c0_21], %37 {strides = array<i32>} : memref<16x32xf32, #tpu.memory_space<vmem>>, vector<16x32xf32>,
    } else {
    }
    %c1_i32 = arith.constant 1 : i32
    %13 = arith.cmpi eq, %arg0, %c1_i32 : i32
    %14 = arith.extui %13 : i1 to i32
    %c0_i32_7 = arith.constant 0 : i32
    %15 = arith.cmpi ne, %14, %c0_i32_7 : i32
    scf.if %15 {
      %c0 = arith.constant 0 : index
      %c0_8 = arith.constant 0 : index
      %16 = vector.load %arg9[%c0, %c0_8] : memref<16x32xf32, #tpu.memory_space<vmem>>, vector<16x32xf32>
      %c0_9 = arith.constant 0 : index
      %c0_10 = arith.constant 0 : index
      %17 = vector.load %arg5[%c0_9, %c0_10] : memref<32x128xf32, #tpu.memory_space<vmem>>, vector<32x128xf32>
      %cst = arith.constant dense<0.000000e+00> : vector<16x128xf32>
      %18 = tpu.matmul %16, %17, %cst {dimension_numbers = #tpu.dot_dimension_numbers<[1], [0], [0], [1], [0, 0, 1, 1], [], []>} : vector<16x32xf32>, vector<32x128xf32>, vector<16x128xf32> -> vector<16x128xf32>
      %c0_11 = arith.constant 0 : index
      %c0_12 = arith.constant 0 : index
      %19 = vector.load %arg6[%c0_11, %c0_12] : memref<16x128xf32, #tpu.memory_space<vmem>>, vector<16x128xf32>
      tpu.vector_store %arg6[%c0_11, %c0_12], %18 {strides = array<i32>} : memref<16x128xf32, #tpu.memory_space<vmem>>, vector<16x128xf32>,
    } else {
    }
    return
  }
  func.func @transform_0(%arg0: i32, %arg1: i32) -> (i32, i32) {
    %c0_i32 = arith.constant 0 : i32
    %c0_i32_0 = arith.constant 0 : i32
    %c0_i32_1 = arith.constant 0 : i32
    return %c0_i32, %c0_i32_0 : i32, i32
  }
  func.func @transform_1(%arg0: i32, %arg1: i32) -> (i32, i32) {
    %c0_i32 = arith.constant 0 : i32
    %c0_i32_0 = arith.constant 0 : i32
    %c0_i32_1 = arith.constant 0 : i32
    return %c0_i32, %c0_i32_0 : i32, i32
  }
  func.func @transform_2(%arg0: i32, %arg1: i32) -> (i32, i32) {
    %c0_i32 = arith.constant 0 : i32
    %c0_i32_0 = arith.constant 0 : i32
    %c0_i32_1 = arith.constant 0 : i32
    return %c0_i32, %c0_i32_0 : i32, i32
  }
  func.func @transform_3(%arg0: i32, %arg1: i32) -> (i32, i32) {
    %c0_i32 = arith.constant 0 : i32
    %c0_i32_0 = arith.constant 0 : i32
    return %c0_i32, %arg1 : i32, i32
  }
  func.func @transform_4(%arg0: i32, %arg1: i32) -> (i32, i32) {
    %0 = arith.muli %arg1, %arg0 : i32
    %c0_i32 = arith.constant 0 : i32
    %c0_i32_0 = arith.constant 0 : i32
    return %c0_i32, %0 : i32, i32
  }
  func.func @transform_5(%arg0: i32, %arg1: i32) -> (i32, i32) {
    %c0_i32 = arith.constant 0 : i32
    %c0_i32_0 = arith.constant 0 : i32
    %c0_i32_1 = arith.constant 0 : i32
    return %c0_i32, %c0_i32_0 : i32, i32
  }
}

</mosaic_0001>

<bundles_post_ra>
// kernel: tpu_custom_call.1
= control target key start
LH: loop header
LB: loop body
LE: loop exit
PB: predicated region body
PF: predicated region fallthrough
CT: control target
= control target key end

     0   :  { %11 = vsyncpa [#allocation5], 0  ;;  %s1006_s0 = inlined_call_operand.hbm [shape: f32[16,32], index: 0, kind: input, shape index: {}]   ;;  %s1007_s1 = inlined_call_operand.hbm [shape: f32[1,16], index: 1, kind: input, shape index: {}]   ;;  %s1008_s2 = inlined_call_operand.vmem [shape: f32[1,16], index: 2, kind: input, shape index: {}]   ;;  %s1009_s3 = inlined_call_operand.hbm [shape: f32[32,128], index: 3, kind: input, shape index: {}]   ;;  %s1010_s4 = inlined_call_operand.hbm [shape: f32[16,128], index: 4, kind: output, shape index: {0}]   ;;  %s1011_s5 = inlined_call_operand.hbm [shape: f32[1,16], index: 5, kind: output, shape index: {1}]  }
   0x1   :  { %12 = vsyncpa [#allocation8], 0 }
   0x2   :  { %13 = vsyncpa [#allocation6], 0 }
   0x3   :  { %15 = vsyncpa [#allocation6 + $0x1], 0 }
   0x4   :  { %16 = vsyncpa [#allocation12], 0  ;;  %s899_s18 = smov 0   ;;  %s901_s19 = smov 0  }
   0x5   :  { %s903_s20 = smov 0  }
   0x6 LB: > { %s203_s23 = sshll.u32 %s1007_s1, 4  ;;  %s553_s24 = sadd.s32 4294967295, %s853_s20   ;;  %s853_s20 = sphi %s903_s20, %s22_s20   ;;  %s849_s19 = sphi %s901_s19, %s1017_s19   ;;  %s845_s18 = sphi %s899_s18, %s1016_s18   ;;  %s204_s23 = int_to_ptr.hbm [resolvable:$true] %s203_s23 }
   0x7   : > { %s554_s25 = sadd.s32 4294967294, %s853_s20   ;;  %p555_p0 = scmp.ge.s32.totalorder %s853_s20, 1 }
   0x8   : > { %p177_p1 = scmp.lt.s32.totalorder %s853_s20, 3  ;;  %p923_p2 = scmp.eq.s32.totalorder %s553_s24, 0 }
   0x9   : > { %s855_s28 = smov [#allocation7]   ;;  %s34_s6 = sadd.s32 1, %s849_s19 }
   0xa   : > { %p927_p3 = pnand %p555_p0, %p177_p1  ;;  %s205_s29 = sshll.u32 %s855_s28, 4  ;;  %s206_s29 = int_to_ptr.vmem [resolvable:$true] %s205_s29 }
   0xb   : > { %s188_s9 = sshll.u32 %s1006_s0, 4  ;;  %p36_p6 = scmp.ge.s32.totalorder %s34_s6, 2  ;;  %s189_s9 = int_to_ptr.hbm [resolvable:$true] %s188_s9 }
   0xc   : > { %p600_p4 = pneg %p927_p3  ;;  %s856_s10 = smov [#allocation4]  }
   0xd   : > { %s1019_s6 = smov (%p36_p6, %s34_s6), 0  ;;  %s190_s11 = sshll.u32 %s856_s10, 4  ;;  %s191_s11 = int_to_ptr.vmem [resolvable:$true] %s190_s11 }
   0xe   : > { %p935_p5 = pnand %p923_p2, %p600_p4  ;;  %s857_s12 = smov 128  }
   0xf   : > { %s858_s13 = smov 8   ;;  %s219_s16 = sshll.u32 %s1009_s3, 4  ;;  %s220_s16 = int_to_ptr.hbm [resolvable:$true] %s219_s16 }
  0x10   : > { %606 = dma.hbm_to_vmem [thread:$0]  (!%p935_p5), %s204_s23, 16, %s206_s29, [#allocation8]  }
  0x11   : > { %603 = dma.hbm_to_vmem [thread:$0]  (!%p935_p5), %s189_s9, 256, %s191_s11, [#allocation5], %s857_s12, %s857_s12, %s858_s13  }
  0x12   : > { %s859_s17 = smov [#allocation9]   ;;  %237 = sbr.rel (%p927_p3) target bundleno = 512 (0x200), region = 36 }
  0x13   : > { %s221_s21 = sshll.u32 %s859_s17, 4  ;;  %s222_s21 = int_to_ptr.vmem [resolvable:$true] %s221_s21 }
  0x14   : > { %609 = dma.hbm_to_vmem [thread:$0]  (!%p935_p5), %s220_s16, 512, %s222_s21, [#allocation8], %s857_s12, %s857_s12, %s858_s13  }
  0x17   : > { %828 = dma.done.wait (%p923_p2), [#allocation5], 256  }
  0x18   : > { %830 = vsyncadd (%p923_p2), [#allocation5], 4294967040 }
  0x19   : > { %832 = dma.done.wait (%p923_p2), [#allocation8], 528  }
  0x1a   : > { %834 = vsyncadd (%p923_p2), [#allocation8], 4294966768  ;;  %p272_p7 = scmp.eq.s32.totalorder %s845_s18, 0 }
  0x1b   : > { %vm278_vm0 = vcmask (%p272_p7), 122880   ;;  %v860_v0 = vmov (%p272_p7), 0.0  }
  0x1c   : > { %277 = sbr.rel (!%p272_p7) target bundleno = 33 (0x21), region = 52  ;;  %279 = vst.msk [vmem:[#allocation2] sm:$0x1] (%p272_p7), %vm278_vm0, %v860_v0 }
  0x21 PF: > { %p564_p8 = scmp.ne.s32.totalorder %s845_s18, 0 }
  0x23   : > { %282 = sbr.rel (%p564_p8) target bundleno = 181 (0xb5), region = 56 }
  0x28   : > { %v284_v1 = vld [vmem:[#allocation9 + $0x8] sm:$0xff]  ;;  %v286_v2 = vld [vmem:[#allocation9 + $0x18] sm:$0xff]  ;;  %v283_v3 = vld [vmem:[#allocation9] sm:$0xff]  ;;  %v861_v11 = vmov 1.0   ;;  %vm315_vm1 = vcmask 122880  }
  0x29   : > { %v288_v4 = vmul.f32 %v284_v1, %v284_v1  ;;  %v290_v5 = vmul.f32 %v286_v2, %v286_v2  ;;  %v285_v6 = vld [vmem:[#allocation9 + $0x10] sm:$0xff]  ;;  %v287_v7 = vmul.f32 %v283_v3, %v283_v3  ;;  %v313_v12 = vld [vmem:[#allocation2] sm:$0x1] }
  0x2a   : > { %v289_v8 = vmul.f32 %v285_v6, %v285_v6 }
  0x2b   : > { %v292_v9 = vadd.f32 %v290_v5, %v288_v4 }
  0x2c   : > { %v291_v10 = vadd.f32 %v289_v8, %v287_v7 }
  0x2d   : > { %307 = vmatpush.xpose.msra.mxu0 %v292_v9 }
  0x31   : > { %308 = vmatpush.xpose.msra.mxu0 %v291_v10 }
  0x34   : > { %309 = vmatmul.f32.vlgmr.msra.gmra.mxu0 %v861_v11 }
  0xb1   : > { %v310_v13 = vpop.f32.mrf.mxu0 }
  0xb2   : > { %v314_v14 = vadd.f32 %v313_v12, %v310_v13 }
  0xb4   : > { %316 = vst.msk [vmem:[#allocation2] sm:$0x1] %vm315_vm1, %v314_v14 }
  0xb5 PF: > { %318 = sbr.rel (!%p272_p7) target bundleno = 360 (0x168), region = 60  ;;  %v319_v15 = vld [vmem:[%s1008_s2] sm:$0x1] (%p272_p7)  ;;  %v862_v18 = vmov (%p272_p7), 2.0   ;;  %v334_v32 = vld [vmem:[#allocation7] sm:$0x1] (%p272_p7) }
  0xb6   : > { %663 = vrcp.f32 (%p272_p7), %v862_v18  ;;  %vm344_vm5 = vcmask (%p272_p7), 122880   ;;  %vm346_vm8 = vcmp.gt.f32.partialorder (%p272_p7), %v319_v15, 0.0  ;;  %v863_v47 = vmov (%p272_p7), 0.0   ;;  %s864_s26 = smov (%p272_p7), 16   ;;  %v372_v55 = vld [vmem:[#allocation4] sm:$0xff] (%p272_p7)  ;;  %v373_v56 = vld [vmem:[#allocation4 + $0x8] sm:$0xff] (%p272_p7) }
  0xb7   : > { %v565_v48 = vsel (%p272_p7), %vm346_vm8, 1.0, %v863_v47  ;;  %vm370_vm11 = vcmask (%p272_p7), 130048   ;;  %vm377_vm12 = vcmask (%p272_p7), 261120  }
  0xbb   : > { %v320_v16 = vld [vmem:[#allocation2] sm:$0x1] }
  0xbc   : > { %v321_v17 = vmul.f32 %v320_v16, %v319_v15  ;;  %v664_v19 = vpop.eup %663 }
  0xbd   : > { %v337_v21 = vmul.f32 2.0, %v664_v19  ;;  %vm341_vm4 = vweird.f32 %v664_v19 }
  0xbe   : > { %665 = vrsqrt.f32 %v321_v17  ;;  %vm329_vm2 = vcmp.eq.f32.partialorder %v321_v17, inf  ;;  %v332_v29 = vand.u32 2147483648, %v321_v17  ;;  %vm331_vm3 = vcmp.eq.f32.partialorder %v321_v17, 0.0 }
  0xbf   : > { %v338_v23 = vsub.f32 1.0, %v337_v21 }
  0xc1   : > { %v339_v26 = vmul.f32 %v664_v19, %v338_v23 }
  0xc3   : > { %v340_v30 = vadd.f32 %v664_v19, %v339_v26 }
  0xc4   : > { %v666_v20 = vpop.eup %665 }
  0xc5   : > { %v323_v22 = vmul.f32 %v666_v20, %v321_v17  ;;  %v342_v35 = vsel %vm341_vm4, %v664_v19, %v340_v30 }
  0xc7   : > { %v324_v24 = vmul.f32 %v666_v20, %v323_v22 }
  0xc9   : > { %v325_v25 = vmul.f32 0.5, %v324_v24 }
  0xcb   : > { %v326_v27 = vsub.f32 1.5, %v325_v25 }
  0xcd   : > { %v327_v28 = vmul.f32 %v666_v20, %v326_v27 }
  0xcf   : > { %v328_v31 = vmul.f32 %v327_v28, %v321_v17 }
  0xd1   : > { %v330_v33 = vsel %vm329_vm2, %v321_v17, %v328_v31 }
  0xd2   : > { %v333_v34 = vsel %vm331_vm3, %v332_v29, %v330_v33 }
  0xd3   : > { %v335_v36 = vadd.f32 %v334_v32, %v333_v34 }
  0xd5   : > { %v343_v37 = vmul.f32 %v342_v35, %v335_v36 }
  0xd7   : > { %345 = vst.msk [vmem:[#allocation11] sm:$0x1] %vm344_vm5, %v343_v37  ;;  %v349_v38 = vadd.f32 1e-05, %v343_v37 }
  0xd9   : > { %667 = vrcp.f32 %v349_v38  ;;  %v361_v41 = vand.u32 2147483648, %v349_v38  ;;  %vm355_vm6 = vweird.f32 %v349_v38  ;;  %v359_v43 = vand.u32 2147483647, %v349_v38 }
  0xdb   : > { %v362_v45 = vor.u32 1.1754944e-38, %v361_v41  ;;  %vm360_vm10 = vcmp.eq.f32.partialorder %v359_v43, 8.507059e+37 }
  0xdf   : > { %v668_v39 = vpop.eup %667 }
  0xe0   : > { %v351_v40 = vmul.f32 %v668_v39, %v349_v38  ;;  %vm356_vm7 = vweird.f32 %v668_v39 }
  0xe1   : > { %vm357_vm9 = vmor %vm355_vm6, %vm356_vm7 }
  0xe2   : > { %v352_v42 = vsub.f32 1.0, %v351_v40 }
  0xe4   : > { %v353_v44 = vmul.f32 %v668_v39, %v352_v42 }
  0xe6   : > { %v354_v46 = vadd.f32 %v668_v39, %v353_v44 }
  0xe8   : > { %v358_v49 = vsel %vm357_vm9, %v668_v39, %v354_v46 }
  0xe9   : > { %v363_v50 = vsel %vm360_vm10, %v362_v45, %v358_v49 }
  0xea   : > { %v364_v51 = vmul.f32 %v565_v48, %v363_v50 }
  0xec   : > { %v366_v52 = vperm.slane %v364_v51, 0 }
  0xee   : > { %367 = vrot.lane.b32.xlu0 %v366_v52, %s864_s26 }
 0x160   : > { %v368_v53 = vpop.permute.xlu0 %367 }
 0x161   : > { %v371_v54 = vsel %vm370_vm11, %v364_v51, %v368_v53 }
 0x162   : > { %v374_v57 = vperm.slane %v371_v54, 0 }
 0x164   : > { %v375_v58 = vmul.f32 %v374_v57, %v372_v55  ;;  %v376_v59 = vmul.f32 %v374_v57, %v373_v56 }
 0x166   : > { %378 = vst.msk [vmem:[#allocation3] sm:$0xff] %vm377_vm12, %v375_v58 }
 0x167   : > { %379 = vst.msk [vmem:[#allocation3 + $0x8] sm:$0xff] %vm377_vm12, %v376_v59 }
 0x168 PF: > { %p566_p9 = scmp.ne.s32.totalorder %s845_s18, 1 }
 0x16a   : > { %383 = sbr.rel (%p566_p9) target bundleno = 503 (0x1f7), region = 64 }
 0x16f   : > { %v389_v60 = vld [vmem:[#allocation9 + $0x18] sm:$0xff]  ;;  %v388_v61 = vld [vmem:[#allocation9 + $0x10] sm:$0xff]  ;;  %v387_v62 = vld [vmem:[#allocation9 + $0x8] sm:$0xff]  ;;  %vm390_vm13 = vcmask 261120  }
 0x170   : > { %409 = vmatpush.msra.mxu0 %v389_v60  ;;  %576 = vmatpush.msra.mxu1 %v389_v60  ;;  %v386_v63 = vld [vmem:[#allocation9] sm:$0xff] }
 0x171   : > { %v384_v0 = vld [vmem:[#allocation3] sm:$0xff]  ;;  %v385_v1 = vld [vmem:[#allocation3 + $0x8] sm:$0xff] }
 0x172   : > { %410 = vmatpush.msra.mxu0 %v388_v61  ;;  %577 = vmatpush.msra.mxu1 %v388_v61 }
 0x174   : > { %411 = vmatpush.msra.mxu0 %v387_v62  ;;  %578 = vmatpush.msra.mxu1 %v387_v62 }
 0x176   : > { %412 = vmatpush.msra.mxu0 %v386_v63  ;;  %579 = vmatpush.msra.mxu1 %v386_v63 }
 0x177   : > { %567 = vmatmul.msk.f32.vlgmr.msra.gmra.mxu0 %vm390_vm13, %v384_v0  ;;  %568 = vmatmul.msk.f32.vlgmr.msra.gmra.mxu1 %vm390_vm13, %v385_v1 }
 0x1f4   : > { %v414_v2 = vpop.f32.mrf.mxu0  ;;  %v417_v3 = vpop.f32.mrf.mxu1 }
 0x1f5   : > { %420 = vst [vmem:[#allocation10] sm:$0xff] %v414_v2 }
 0x1f6   : > { %421 = vst [vmem:[#allocation10 + $0x8] sm:$0xff] %v417_v3 }
 0x1f7 PF: > { %p976_p10 = scmp.eq.s32.totalorder %s553_s24, 1  ;;  %s437_s29 = sshll.u32 %s1010_s4, 4  ;;  %s438_s29 = int_to_ptr.hbm [resolvable:$true] %s437_s29 }
 0x1f8   : > { %s865_s30 = smov [#allocation10]   ;;  %s866_s8 = smov 128  }
 0x1f9   : > { %s435_s7 = sshll.u32 %s865_s30, 4  ;;  %s867_s9 = smov 8   ;;  %s436_s7 = int_to_ptr.vmem [resolvable:$true] %s435_s7 }
 0x1fa   : > { %593 = dma.vmem_to_hbm [thread:$0]  (%p976_p10), %s436_s7, 256, %s438_s29, [#allocation6], %s866_s8, %s866_s8, %s867_s9  }
 0x1fb   : > { %s868_s10 = smov [#allocation11]   ;;  %s452_s13 = sshll.u32 %s1011_s5, 4  ;;  %s453_s13 = int_to_ptr.hbm [resolvable:$true] %s452_s13 }
 0x1fc   : > { %s450_s24 = sshll.u32 %s868_s10, 4  ;;  %s451_s24 = int_to_ptr.vmem [resolvable:$true] %s450_s24 }
 0x1fd   : > { %595 = dma.vmem_to_hbm [thread:$0]  (%p976_p10), %s451_s24, 16, %s453_s13, [#allocation12]  }
 0x1fe   : > { %836 = dma.done.wait (%p976_p10), [#allocation12], 16  }
 0x1ff   : > { %838 = vsyncadd (%p976_p10), [#allocation12], 4294967280 }
 0x200 PF: > { %p623_p11 = scmp.ge.s32.totalorder %s853_s20, 2  ;;  %p624_p12 = scmp.eq.s32.totalorder %s554_s25, 1 }
 0x202   : > { %p611_p13 = pnand %p624_p12, %p623_p11 }
 0x204   : > { %p612_p0 = pneg %p611_p13 }
 0x206   : > { %840 = dma.done.wait (%p612_p0), [#allocation6], 256  }
 0x207   : > { %842 = vsyncadd (%p612_p0), [#allocation6], 4294967040  ;;  %s22_s20 = sadd.s32 1, %s853_s20   ;;  %s1016_s18 = smov %s849_s19 }
 0x208   : > { %p19_p1 = scmp.ge.s32.totalorder %s22_s20, 4   ;;  %s1017_s19 = smov %s1019_s6 }
 0x20a   :  { %21 = sbr.rel (!%p19_p1) target bundleno = 6 (0x6), region = 106 }
 0x20f   :  { %476 = vsyncpa [#allocation5], 1 }
 0x210   :  { %478 = vsyncpa [#allocation5 + $0x1], 1 }
 0x211   :  { %479 = vsyncpa [#allocation8], 1 }
 0x212   :  { %480 = vsyncpa [#allocation6], 1 }
 0x213   :  { %482 = vsyncpa [#allocation6 + $0x1], 1 }
 0x214   :  { %483 = vsyncpa [#allocation12], 1 }

</bundles_post_ra>
